<compile_context>
chip_gen: v7x
topology: tpu7x:2x2x1
jax: 0.10.0
libtpu: 0.0.40
codegen_flags: <defaults>
</compile_context>

<pallas_src>
import functools
import math

import jax
import jax.numpy as jnp
from jax.experimental import pallas as pl
from jax.experimental.pallas import tpu as pltpu


# ----------------------------- fused Pallas kernel ---------------------------


def _mha_layer_kernel(
    x_ref,        # (1, S, E)    current batch element (read only at l == 0)
    w_in_t_ref,   # (1, E, 3E)   this layer's in_proj_weight^T (Q cols pre-scaled)
    b_in_ref,     # (1, 1, 3E)   this layer's in_proj_bias    (Q third pre-scaled)
    w_out_t_ref,  # (1, E, E)    this layer's out_proj.weight^T
    b_out_ref,    # (1, 1, E)    this layer's out_proj.bias
    o_ref,        # (1, S, E)    written only at l == L-1
    h_ref,        # VMEM (S, E) f32  activation carried across the layer axis
    attn_ref,     # VMEM (S, E) f32  per-head PV assembly buffer
    *,
    num_heads: int,
):
    l = pl.program_id(1)

    # New batch element: load the input activation into the resident carry.
    @pl.when(l == 0)
    def _():
        h_ref[...] = x_ref[0].astype(jnp.float32)

    S, E = h_ref.shape
    H = num_heads
    Dh = E // H
    mx_dtype = w_in_t_ref.dtype          # matmul input dtype chosen in pack_params

    h = h_ref[...]                        # (S, E) f32, resident across layers

    # Fused QKV projection (scale already folded into the Q columns / bias).
    qkv = jnp.dot(h.astype(mx_dtype), w_in_t_ref[0],
                  preferred_element_type=jnp.float32) + b_in_ref[0]     # (S, 3E) f32
    qkv_mx = qkv.astype(mx_dtype)        # single cast per layer (no-op in f32 mode)

    # Head-major (H, S, Dh) stacks along a LEADING batch dim (no vector transpose):
    # leading-dim stack of static lane slices, then head-batched MXU contractions.
    q3 = jnp.stack([qkv_mx[:, 0 * E + hh * Dh: 0 * E + (hh + 1) * Dh]
                    for hh in range(H)], axis=0)                         # (H, S, Dh)
    k3 = jnp.stack([qkv_mx[:, 1 * E + hh * Dh: 1 * E + (hh + 1) * Dh]
                    for hh in range(H)], axis=0)                         # (H, S, Dh)
    v3 = jnp.stack([qkv_mx[:, 2 * E + hh * Dh: 2 * E + (hh + 1) * Dh]
                    for hh in range(H)], axis=0)                         # (H, S, Dh)

    # Head-batched scores + numerically-stable softmax (one pass over all heads).
    scores = jnp.einsum("hqd,hkd->hqk", q3, k3,
                        preferred_element_type=jnp.float32)              # (H, S, S)
    m = jnp.max(scores, axis=-1, keepdims=True)
    p = jnp.exp(scores - m)
    denom = jnp.sum(p, axis=-1, keepdims=True)                           # (H, S, 1)

    # Normalize AFTER the PV matmul: (H,S,Dh) multiplies instead of (H,S,S) divides.
    pv = jnp.einsum("hqk,hkd->hqd", p.astype(mx_dtype), v3,
                    preferred_element_type=jnp.float32)                  # (H, S, Dh)
    pv = pv * pl.reciprocal(denom, approx=False)

    # Reassemble concat(heads) via lane-slice stores (no jnp.concatenate / live list),
    # then one (S,E)@(E,E) out-projection for all heads.
    for hh in range(H):
        attn_ref[:, hh * Dh:(hh + 1) * Dh] = pv[hh]
    h_new = jnp.dot(attn_ref[...].astype(mx_dtype), w_out_t_ref[0],
                    preferred_element_type=jnp.float32) + b_out_ref[0]   # (S, E) f32
    h_ref[...] = h_new

    # Last layer: flush to HBM.
    @pl.when(l == pl.num_programs(1) - 1)
    def _():
        o_ref[0] = h_new.astype(o_ref.dtype)


# ------------------------------- wrappers -------------------------------------


def pack_params(params, num_heads, *, matmul_dtype=jnp.float32):
    """Stack, pre-transpose, pre-scale (and optionally pre-cast) weights ONCE.

    params: list of (in_proj_weight (3E,E), in_proj_bias (3E,),
                     out_proj_weight (E,E), out_proj_bias (E,)).
    matmul_dtype: jnp.float32 (exact) or jnp.bfloat16 (fast MXU path on v5e/v6e/v7x,
                  halves weight DMA + VMEM footprint; biases stay f32).
    """
    E = params[0][0].shape[1]
    head_dim = E // num_heads
    scale = 1.0 / math.sqrt(head_dim)
    # Fold 1/sqrt(Dh) into the Q third of the in-projection (columns 0:E).
    col_scale = jnp.concatenate([jnp.full((E,), scale, jnp.float32),
                                 jnp.ones((2 * E,), jnp.float32)])

    w_in_t = jnp.stack([jnp.transpose(w_in) * col_scale[None, :]
                        for (w_in, _, _, _) in params]).astype(matmul_dtype)   # (L,E,3E)
    b_in = jnp.stack([(b * col_scale).reshape(1, -1)
                      for (_, b, _, _) in params]).astype(jnp.float32)         # (L,1,3E)
    w_out_t = jnp.stack([jnp.transpose(w_o)
                         for (_, _, w_o, _) in params]).astype(matmul_dtype)   # (L,E,E)
    b_out = jnp.stack([b.reshape(1, -1)
                       for (_, _, _, b) in params]).astype(jnp.float32)        # (L,1,E)
    return w_in_t, b_in, w_out_t, b_out


def multihead_self_attention_stack(x_sbe, packed_params, num_heads):
    """Forward of MultiheadSelfAttentionStack.

    x_sbe: (S, B, E) -- PyTorch batch_first=False convention.
    packed_params: output of pack_params().
    """
    w_in_t, b_in, w_out_t, b_out = packed_params
    L, E, threeE = w_in_t.shape
    S, B, E_x = x_sbe.shape
    assert E_x == E and threeE == 3 * E
    assert E % num_heads == 0, "embed_dim must be divisible by num_heads"
    H = num_heads
    w_bytes = jnp.dtype(w_in_t.dtype).itemsize

    # One tiny relayout per forward (not per layer).
    x_bse = jnp.transpose(x_sbe, (1, 0, 2))                  # (B, S, E)

    kernel = functools.partial(_mha_layer_kernel, num_heads=num_heads)

    # VMEM budget: double-buffered per-layer weights + activation blocks +
    # scratches + head-batched scores + qkv temporaries, with 2x headroom.
    per_layer_w = (E * 3 * E + E * E) * w_bytes + (3 * E + E) * 4
    resident = (2 * per_layer_w                 # weights, 2-deep pipeline
                + 4 * S * E * 4                 # x / o blocks (double-buffered)
                + 2 * S * E * 4                 # h + attn scratches
                + H * S * S * 4                 # scores / p
                + 2 * S * 3 * E * 4)            # qkv (f32 + matmul-dtype copy)
    vmem_limit = int(min(max(2 * resident, 16 << 20), 64 << 20))

    flops = 2 * B * L * (S * E * 3 * E + 2 * S * S * E + S * E * E)
    transcendentals = B * L * H * S * S
    bytes_accessed = (2 * B * S * E * 4
                      + B * (L * (E * 3 * E + E * E) * w_bytes + L * 4 * E * 4))

    out_bse = pl.pallas_call(
        kernel,
        out_shape=jax.ShapeDtypeStruct((B, S, E), x_sbe.dtype),
        grid=(B, L),
        in_specs=[
            pl.BlockSpec((1, S, E), lambda b, l: (b, 0, 0)),        # activation block
            pl.BlockSpec((1, E, 3 * E), lambda b, l: (l, 0, 0)),    # per-layer weights:
            pl.BlockSpec((1, 1, 3 * E), lambda b, l: (l, 0, 0)),    # layer l+1 prefetched
            pl.BlockSpec((1, E, E), lambda b, l: (l, 0, 0)),        # under layer l compute
            pl.BlockSpec((1, 1, E), lambda b, l: (l, 0, 0)),
        ],
        out_specs=pl.BlockSpec((1, S, E), lambda b, l: (b, 0, 0)),
        scratch_shapes=[
            pltpu.VMEM((S, E), jnp.float32),    # h: activation carried across layers
            pltpu.VMEM((S, E), jnp.float32),    # attn: concat(heads) assembly buffer
        ],
        compiler_params=pltpu.CompilerParams(
            dimension_semantics=("parallel", "arbitrary"),  # batch across TCs, layers serial
            vmem_limit_bytes=vmem_limit,
        ),
        cost_estimate=pl.CostEstimate(flops=flops,
                                      transcendentals=transcendentals,
                                      bytes_accessed=bytes_accessed),
    )(x_bse, w_in_t, b_in, w_out_t, b_out)

    return jnp.transpose(out_bse, (1, 0, 2))                 # -> (S, B, E)


# --------------------------- pure-JAX reference --------------------------------


def _mha_reference(x_sbe, params, num_heads):
    x = x_sbe.astype(jnp.float32)
    S, B, E = x.shape
    head_dim = E // num_heads
    scale = 1.0 / math.sqrt(head_dim)
    for (w_in, b_in, w_out, b_out) in params:
        qkv = jnp.einsum("sbe,fe->sbf", x, w_in) + b_in       # (S, B, 3E)
        q, k, v = jnp.split(qkv, 3, axis=-1)
        q = q.reshape(S, B, num_heads, head_dim)
        k = k.reshape(S, B, num_heads, head_dim)
        v = v.reshape(S, B, num_heads, head_dim)
        scores = jnp.einsum("sbhd,tbhd->bhst", q, k) * scale  # (B, H, S, S)
        p = jax.nn.softmax(scores, axis=-1)
        o = jnp.einsum("bhst,tbhd->sbhd", p, v).reshape(S, B, E)
        x = jnp.einsum("sbe,fe->sbf", o, w_out) + b_out
    return x


# ---------------------------------- main ---------------------------------------


if __name__ == "__main__":
    # Small shapes consistent with the module: embed_dim=32, num_heads=4,
    # num_layers=2, seq_len=8, batch=2.
    embed_dim = 32
    num_heads = 4
    num_layers = 2
    seq_len = 8
    batch = 2

    key = jax.random.PRNGKey(0)
    key, xk = jax.random.split(key)
    x = jax.random.normal(xk, (seq_len, batch, embed_dim), dtype=jnp.float32)

    # Deterministic synthetic parameters (shapes follow nn.MultiheadAttention).
    params = []
    for _ in range(num_layers):
        key, k1, k2, k3, k4 = jax.random.split(key, 5)
        w_in = jax.random.normal(k1, (3 * embed_dim, embed_dim), jnp.float32) * 0.1
        b_in = jax.random.normal(k2, (3 * embed_dim,), jnp.float32) * 0.05
        w_out = jax.random.normal(k3, (embed_dim, embed_dim), jnp.float32) * 0.1
        b_out = jax.random.normal(k4, (embed_dim,), jnp.float32) * 0.05
        params.append((w_in, b_in, w_out, b_out))

    # Stack / transpose / fold-scale once, outside the hot path.  Pass
    # matmul_dtype=jnp.bfloat16 for the fast MXU path (looser numerics).
    packed = pack_params(params, num_heads, matmul_dtype=jnp.float32)

    out = multihead_self_attention_stack(x, packed, num_heads)
    out = jax.block_until_ready(out)
    assert out.shape == (seq_len, batch, embed_dim)

    # Strict reference check only for the exact-f32 matmul path.
    if packed[0].dtype == jnp.float32:
        ref = _mha_reference(x, params, num_heads)
        assert jnp.allclose(out, ref, atol=1e-4, rtol=1e-4), "mismatch vs reference"

    print("KERNEL_OK")
</pallas_src>

<mosaic_0001>
module attributes {stable_mosaic.version = 11 : i64} {
  func.func @_mha_layer_kernel(%arg0: i32, %arg1: i32, %arg2: memref<1x8x32xf32, #tpu.memory_space<vmem>>, %arg3: memref<1x32x96xf32, #tpu.memory_space<vmem>>, %arg4: memref<1x1x96xf32, #tpu.memory_space<vmem>>, %arg5: memref<1x32x32xf32, #tpu.memory_space<vmem>>, %arg6: memref<1x1x32xf32, #tpu.memory_space<vmem>>, %arg7: memref<1x8x32xf32, #tpu.memory_space<vmem>>, %arg8: memref<8x32xf32, #tpu.memory_space<vmem>>, %arg9: memref<8x32xf32, #tpu.memory_space<vmem>>) attributes {dimension_semantics = [#tpu.dimension_semantics<parallel>, #tpu.dimension_semantics<arbitrary>], iteration_bounds = array<i64: 2, 2>, scalar_prefetch = 0 : i64, scratch_operands = 2 : i64, tpu.core_type = #tpu.core_type<tc>, window_params = [{transform_indices = @transform_0, window_bounds = array<i64: 1, 8, 32>}, {transform_indices = @transform_1, window_bounds = array<i64: 1, 32, 96>}, {transform_indices = @transform_2, window_bounds = array<i64: 1, 1, 96>}, {transform_indices = @transform_3, window_bounds = array<i64: 1, 32, 32>}, {transform_indices = @transform_4, window_bounds = array<i64: 1, 1, 32>}, {transform_indices = @transform_5, window_bounds = array<i64: 1, 8, 32>}]} {
    %c0_i32 = arith.constant 0 : i32
    %0 = arith.cmpi eq, %arg1, %c0_i32 : i32
    %1 = arith.extui %0 : i1 to i32
    %c0_i32_0 = arith.constant 0 : i32
    %2 = arith.cmpi ne, %1, %c0_i32_0 : i32
    scf.if %2 {
      %c0_29 = arith.constant 0 : index
      %c0_30 = arith.constant 0 : index
      %c0_31 = arith.constant 0 : index
      %74 = vector.load %arg2[%c0_29, %c0_30, %c0_31] : memref<1x8x32xf32, #tpu.memory_space<vmem>>, vector<1x8x32xf32>
      %75 = vector.shape_cast %74 : vector<1x8x32xf32> to vector<8x32xf32>
      %c0_32 = arith.constant 0 : index
      %c0_33 = arith.constant 0 : index
      %76 = vector.load %arg8[%c0_32, %c0_33] : memref<8x32xf32, #tpu.memory_space<vmem>>, vector<8x32xf32>
      tpu.vector_store %arg8[%c0_32, %c0_33], %75 {strides = array<i32>} : memref<8x32xf32, #tpu.memory_space<vmem>>, vector<8x32xf32>,
    } else {
    }
    %c0 = arith.constant 0 : index
    %c0_1 = arith.constant 0 : index
    %3 = vector.load %arg8[%c0, %c0_1] : memref<8x32xf32, #tpu.memory_space<vmem>>, vector<8x32xf32>
    %c0_2 = arith.constant 0 : index
    %c0_3 = arith.constant 0 : index
    %c0_4 = arith.constant 0 : index
    %4 = vector.load %arg3[%c0_2, %c0_3, %c0_4] : memref<1x32x96xf32, #tpu.memory_space<vmem>>, vector<1x32x96xf32>
    %5 = vector.shape_cast %4 : vector<1x32x96xf32> to vector<32x96xf32>
    %cst = arith.constant dense<0.000000e+00> : vector<8x96xf32>
    %6 = tpu.matmul %3, %5, %cst {dimension_numbers = #tpu.dot_dimension_numbers<[1], [0], [0], [1], [0, 0, 1, 1], [], []>} : vector<8x32xf32>, vector<32x96xf32>, vector<8x96xf32> -> vector<8x96xf32>
    %c0_5 = arith.constant 0 : index
    %c0_6 = arith.constant 0 : index
    %c0_7 = arith.constant 0 : index
    %7 = vector.load %arg4[%c0_5, %c0_6, %c0_7] : memref<1x1x96xf32, #tpu.memory_space<vmem>>, vector<1x1x96xf32>
    %8 = vector.shape_cast %7 : vector<1x1x96xf32> to vector<1x96xf32>
    %9 = vector.broadcast %8 : vector<1x96xf32> to vector<8x96xf32>
    %10 = arith.addf %6, %9 : vector<8x96xf32>
    %11 = vector.extract_strided_slice %10 {offsets = [0, 0], sizes = [8, 8], strides = [1, 1]} : vector<8x96xf32> to vector<8x8xf32>
    %12 = vector.extract_strided_slice %10 {offsets = [0, 8], sizes = [8, 8], strides = [1, 1]} : vector<8x96xf32> to vector<8x8xf32>
    %13 = vector.extract_strided_slice %10 {offsets = [0, 16], sizes = [8, 8], strides = [1, 1]} : vector<8x96xf32> to vector<8x8xf32>
    %14 = vector.extract_strided_slice %10 {offsets = [0, 24], sizes = [8, 8], strides = [1, 1]} : vector<8x96xf32> to vector<8x8xf32>
    %15 = vector.shape_cast %11 : vector<8x8xf32> to vector<1x8x8xf32>
    %16 = vector.shape_cast %12 : vector<8x8xf32> to vector<1x8x8xf32>
    %17 = vector.shape_cast %13 : vector<8x8xf32> to vector<1x8x8xf32>
    %18 = vector.shape_cast %14 : vector<8x8xf32> to vector<1x8x8xf32>
    %19 = tpu.concatenate %15, %16, %17, %18 in 0 : vector<1x8x8xf32>, vector<1x8x8xf32>, vector<1x8x8xf32>, vector<1x8x8xf32> -> vector<4x8x8xf32>
    %20 = vector.extract_strided_slice %10 {offsets = [0, 32], sizes = [8, 8], strides = [1, 1]} : vector<8x96xf32> to vector<8x8xf32>
    %21 = vector.extract_strided_slice %10 {offsets = [0, 40], sizes = [8, 8], strides = [1, 1]} : vector<8x96xf32> to vector<8x8xf32>
    %22 = vector.extract_strided_slice %10 {offsets = [0, 48], sizes = [8, 8], strides = [1, 1]} : vector<8x96xf32> to vector<8x8xf32>
    %23 = vector.extract_strided_slice %10 {offsets = [0, 56], sizes = [8, 8], strides = [1, 1]} : vector<8x96xf32> to vector<8x8xf32>
    %24 = vector.shape_cast %20 : vector<8x8xf32> to vector<1x8x8xf32>
    %25 = vector.shape_cast %21 : vector<8x8xf32> to vector<1x8x8xf32>
    %26 = vector.shape_cast %22 : vector<8x8xf32> to vector<1x8x8xf32>
    %27 = vector.shape_cast %23 : vector<8x8xf32> to vector<1x8x8xf32>
    %28 = tpu.concatenate %24, %25, %26, %27 in 0 : vector<1x8x8xf32>, vector<1x8x8xf32>, vector<1x8x8xf32>, vector<1x8x8xf32> -> vector<4x8x8xf32>
    %29 = vector.extract_strided_slice %10 {offsets = [0, 64], sizes = [8, 8], strides = [1, 1]} : vector<8x96xf32> to vector<8x8xf32>
    %30 = vector.extract_strided_slice %10 {offsets = [0, 72], sizes = [8, 8], strides = [1, 1]} : vector<8x96xf32> to vector<8x8xf32>
    %31 = vector.extract_strided_slice %10 {offsets = [0, 80], sizes = [8, 8], strides = [1, 1]} : vector<8x96xf32> to vector<8x8xf32>
    %32 = vector.extract_strided_slice %10 {offsets = [0, 88], sizes = [8, 8], strides = [1, 1]} : vector<8x96xf32> to vector<8x8xf32>
    %33 = vector.shape_cast %29 : vector<8x8xf32> to vector<1x8x8xf32>
    %34 = vector.shape_cast %30 : vector<8x8xf32> to vector<1x8x8xf32>
    %35 = vector.shape_cast %31 : vector<8x8xf32> to vector<1x8x8xf32>
    %36 = vector.shape_cast %32 : vector<8x8xf32> to vector<1x8x8xf32>
    %37 = tpu.concatenate %33, %34, %35, %36 in 0 : vector<1x8x8xf32>, vector<1x8x8xf32>, vector<1x8x8xf32>, vector<1x8x8xf32> -> vector<4x8x8xf32>
    "tpu.trace_start"() <{level = 10 : i32, message = "hqd,hkd->hqk"}> : () -> ()
    %cst_8 = arith.constant dense<0.000000e+00> : vector<4x8x8xf32>
    %38 = tpu.matmul %19, %28, %cst_8 {dimension_numbers = #tpu.dot_dimension_numbers<[2], [2], [1], [1], [0, 0, 0, 1, 1, 1], [0], [0]>} : vector<4x8x8xf32>, vector<4x8x8xf32>, vector<4x8x8xf32> -> vector<4x8x8xf32>
    "tpu.trace_stop"() : () -> ()
    %cst_9 = arith.constant dense<0xFF800000> : vector<4x8xf32>
    %39 = vector.multi_reduction <maximumf>, %38, %cst_9 [2] : vector<4x8x8xf32> to vector<4x8xf32>
    %40 = vector.shape_cast %39 : vector<4x8xf32> to vector<4x8x1xf32>
    %41 = vector.broadcast %40 : vector<4x8x1xf32> to vector<4x8x8xf32>
    %42 = arith.subf %38, %41 : vector<4x8x8xf32>
    %43 = math.exp %42 : vector<4x8x8xf32>
    %cst_10 = arith.constant dense<0.000000e+00> : vector<4x8xf32>
    %44 = vector.multi_reduction <add>, %43, %cst_10 [2] : vector<4x8x8xf32> to vector<4x8xf32>
    %45 = vector.shape_cast %44 : vector<4x8xf32> to vector<4x8x1xf32>
    "tpu.trace_start"() <{level = 10 : i32, message = "hqk,hkd->hqd"}> : () -> ()
    %cst_11 = arith.constant dense<0.000000e+00> : vector<4x8x8xf32>
    %46 = tpu.matmul %43, %37, %cst_11 {dimension_numbers = #tpu.dot_dimension_numbers<[2], [1], [1], [2], [0, 0, 0, 1, 1, 2], [0], [0]>} : vector<4x8x8xf32>, vector<4x8x8xf32>, vector<4x8x8xf32> -> vector<4x8x8xf32>
    "tpu.trace_stop"() : () -> ()
    %47 = tpu.reciprocal %45 : vector<4x8x1xf32> -> vector<4x8x1xf32>
    %48 = vector.broadcast %47 : vector<4x8x1xf32> to vector<4x8x8xf32>
    %49 = arith.mulf %46, %48 : vector<4x8x8xf32>
    %50 = vector.extract_strided_slice %49 {offsets = [0, 0, 0], sizes = [1, 8, 8], strides = [1, 1, 1]} : vector<4x8x8xf32> to vector<1x8x8xf32>
    %51 = vector.shape_cast %50 : vector<1x8x8xf32> to vector<8x8xf32>
    %c0_12 = arith.constant 0 : index
    %c0_13 = arith.constant 0 : index
    %52 = vector.load %arg9[%c0_12, %c0_13] : memref<8x32xf32, #tpu.memory_space<vmem>>, vector<8x8xf32>
    tpu.vector_store %arg9[%c0_12, %c0_13], %51 {strides = array<i32>} : memref<8x32xf32, #tpu.memory_space<vmem>>, vector<8x8xf32>,
    %53 = vector.extract_strided_slice %49 {offsets = [1, 0, 0], sizes = [1, 8, 8], strides = [1, 1, 1]} : vector<4x8x8xf32> to vector<1x8x8xf32>
    %54 = vector.shape_cast %53 : vector<1x8x8xf32> to vector<8x8xf32>
    %c0_14 = arith.constant 0 : index
    %c8 = arith.constant 8 : index
    %55 = vector.load %arg9[%c0_14, %c8] : memref<8x32xf32, #tpu.memory_space<vmem>>, vector<8x8xf32>
    tpu.vector_store %arg9[%c0_14, %c8], %54 {strides = array<i32>} : memref<8x32xf32, #tpu.memory_space<vmem>>, vector<8x8xf32>,
    %56 = vector.extract_strided_slice %49 {offsets = [2, 0, 0], sizes = [1, 8, 8], strides = [1, 1, 1]} : vector<4x8x8xf32> to vector<1x8x8xf32>
    %57 = vector.shape_cast %56 : vector<1x8x8xf32> to vector<8x8xf32>
    %c0_15 = arith.constant 0 : index
    %c16 = arith.constant 16 : index
    %58 = vector.load %arg9[%c0_15, %c16] : memref<8x32xf32, #tpu.memory_space<vmem>>, vector<8x8xf32>
    tpu.vector_store %arg9[%c0_15, %c16], %57 {strides = array<i32>} : memref<8x32xf32, #tpu.memory_space<vmem>>, vector<8x8xf32>,
    %59 = vector.extract_strided_slice %49 {offsets = [3, 0, 0], sizes = [1, 8, 8], strides = [1, 1, 1]} : vector<4x8x8xf32> to vector<1x8x8xf32>
    %60 = vector.shape_cast %59 : vector<1x8x8xf32> to vector<8x8xf32>
    %c0_16 = arith.constant 0 : index
    %c24 = arith.constant 24 : index
    %61 = vector.load %arg9[%c0_16, %c24] : memref<8x32xf32, #tpu.memory_space<vmem>>, vector<8x8xf32>
    tpu.vector_store %arg9[%c0_16, %c24], %60 {strides = array<i32>} : memref<8x32xf32, #tpu.memory_space<vmem>>, vector<8x8xf32>,
    %c0_17 = arith.constant 0 : index
    %c0_18 = arith.constant 0 : index
    %62 = vector.load %arg9[%c0_17, %c0_18] : memref<8x32xf32, #tpu.memory_space<vmem>>, vector<8x32xf32>
    %c0_19 = arith.constant 0 : index
    %c0_20 = arith.constant 0 : index
    %c0_21 = arith.constant 0 : index
    %63 = vector.load %arg5[%c0_19, %c0_20, %c0_21] : memref<1x32x32xf32, #tpu.memory_space<vmem>>, vector<1x32x32xf32>
    %64 = vector.shape_cast %63 : vector<1x32x32xf32> to vector<32x32xf32>
    %cst_22 = arith.constant dense<0.000000e+00> : vector<8x32xf32>
    %65 = tpu.matmul %62, %64, %cst_22 {dimension_numbers = #tpu.dot_dimension_numbers<[1], [0], [0], [1], [0, 0, 1, 1], [], []>} : vector<8x32xf32>, vector<32x32xf32>, vector<8x32xf32> -> vector<8x32xf32>
    %c0_23 = arith.constant 0 : index
    %c0_24 = arith.constant 0 : index
    %c0_25 = arith.constant 0 : index
    %66 = vector.load %arg6[%c0_23, %c0_24, %c0_25] : memref<1x1x32xf32, #tpu.memory_space<vmem>>, vector<1x1x32xf32>
    %67 = vector.shape_cast %66 : vector<1x1x32xf32> to vector<1x32xf32>
    %68 = vector.broadcast %67 : vector<1x32xf32> to vector<8x32xf32>
    %69 = arith.addf %65, %68 : vector<8x32xf32>
    %c0_26 = arith.constant 0 : index
    %c0_27 = arith.constant 0 : index
    %70 = vector.load %arg8[%c0_26, %c0_27] : memref<8x32xf32, #tpu.memory_space<vmem>>, vector<8x32xf32>
    tpu.vector_store %arg8[%c0_26, %c0_27], %69 {strides = array<i32>} : memref<8x32xf32, #tpu.memory_space<vmem>>, vector<8x32xf32>,
    %c1_i32 = arith.constant 1 : i32
    %71 = arith.cmpi eq, %arg1, %c1_i32 : i32
    %72 = arith.extui %71 : i1 to i32
    %c0_i32_28 = arith.constant 0 : i32
    %73 = arith.cmpi ne, %72, %c0_i32_28 : i32
    scf.if %73 {
      %c0_29 = arith.constant 0 : index
      %c0_30 = arith.constant 0 : index
      %c0_31 = arith.constant 0 : index
      %74 = vector.load %arg7[%c0_29, %c0_30, %c0_31] : memref<1x8x32xf32, #tpu.memory_space<vmem>>, vector<1x8x32xf32>
      %75 = vector.shape_cast %74 : vector<1x8x32xf32> to vector<8x32xf32>
      %76 = vector.shape_cast %69 : vector<8x32xf32> to vector<1x8x32xf32>
      tpu.vector_store %arg7[%c0_29, %c0_30, %c0_31], %76 {strides = array<i32>} : memref<1x8x32xf32, #tpu.memory_space<vmem>>, vector<1x8x32xf32>,
    } else {
    }
    return
  }
  func.func @transform_0(%arg0: i32, %arg1: i32) -> (i32, i32, i32) {
    %c0_i32 = arith.constant 0 : i32
    %c0_i32_0 = arith.constant 0 : i32
    %c0_i32_1 = arith.constant 0 : i32
    return %arg0, %c0_i32, %c0_i32_0 : i32, i32, i32
  }
  func.func @transform_1(%arg0: i32, %arg1: i32) -> (i32, i32, i32) {
    %c0_i32 = arith.constant 0 : i32
    %c0_i32_0 = arith.constant 0 : i32
    %c0_i32_1 = arith.constant 0 : i32
    return %arg1, %c0_i32, %c0_i32_0 : i32, i32, i32
  }
  func.func @transform_2(%arg0: i32, %arg1: i32) -> (i32, i32, i32) {
    %c0_i32 = arith.constant 0 : i32
    %c0_i32_0 = arith.constant 0 : i32
    %c0_i32_1 = arith.constant 0 : i32
    return %arg1, %c0_i32, %c0_i32_0 : i32, i32, i32
  }
  func.func @transform_3(%arg0: i32, %arg1: i32) -> (i32, i32, i32) {
    %c0_i32 = arith.constant 0 : i32
    %c0_i32_0 = arith.constant 0 : i32
    %c0_i32_1 = arith.constant 0 : i32
    return %arg1, %c0_i32, %c0_i32_0 : i32, i32, i32
  }
  func.func @transform_4(%arg0: i32, %arg1: i32) -> (i32, i32, i32) {
    %c0_i32 = arith.constant 0 : i32
    %c0_i32_0 = arith.constant 0 : i32
    %c0_i32_1 = arith.constant 0 : i32
    return %arg1, %c0_i32, %c0_i32_0 : i32, i32, i32
  }
  func.func @transform_5(%arg0: i32, %arg1: i32) -> (i32, i32, i32) {
    %c0_i32 = arith.constant 0 : i32
    %c0_i32_0 = arith.constant 0 : i32
    %c0_i32_1 = arith.constant 0 : i32
    return %arg0, %c0_i32, %c0_i32_0 : i32, i32, i32
  }
}

</mosaic_0001>

<bundles_post_ra>
// kernel: tpu_custom_call.1
= control target key start
LH: loop header
LB: loop body
LE: loop exit
PB: predicated region body
PF: predicated region fallthrough
CT: control target
= control target key end

     0   :  { %s2364_s0 = inlined_call_operand.hbm [shape: f32[2,8,32], index: 0, kind: input, shape index: {}]   ;;  %s2365_s1 = inlined_call_operand.hbm [shape: f32[2,32,96], index: 1, kind: input, shape index: {}]   ;;  %s2366_s2 = inlined_call_operand.vmem [shape: f32[2,1,96], index: 2, kind: input, shape index: {}]   ;;  %s2367_s3 = inlined_call_operand.hbm [shape: f32[2,32,32], index: 3, kind: input, shape index: {}]   ;;  %s2368_s4 = inlined_call_operand.vmem [shape: f32[2,1,32], index: 4, kind: input, shape index: {}]   ;;  %s2369_s5 = inlined_call_operand.hbm [shape: f32[2,8,32], index: 5, kind: output, shape index: {}]  }
   0x1   :  { %2385 = sst [smem:[#allocation21_spill]] %s2365_s1 }
   0x2   :  { %2386 = sst [smem:[#allocation22_spill]] %s2368_s4 }
   0x3   :  { %2387 = sst [smem:[#allocation23_spill]] %s2369_s5 }
   0x4   :  { %10 = vsyncpa [#allocation5], 0 }
   0x5   :  { %12 = vsyncpa [#allocation5 + $0x1], 0 }
   0x6   :  { %13 = vsyncpa [#allocation8], 0 }
   0x7   :  { %15 = vsyncpa [#allocation8 + $0x1], 0 }
   0x8   :  { %16 = vsyncpa [#allocation6], 0 }
   0x9   :  { %18 = vsyncpa [#allocation6 + $0x1], 0  ;;  %s1923_s18 = smov 0   ;;  %s1925_s19 = smov 0  }
   0xa   :  { %s1927_s20 = smov 0   ;;  %s1929_s21 = smov 0  }
   0xb   :  { %s1931_s22 = smov 0   ;;  %s1933_s23 = smov 0  }
   0xc   :  { %s1935_s24 = smov 0   ;;  %s1937_s25 = smov 0  }
   0xd   :  { %s1939_s26 = smov 0   ;;  %s1941_s27 = smov 0  }
   0xe   :  { %s1943_s28 = smov 0  }
   0xf LB: > { %2388 = sst [smem:[#allocation14_spill]] %s1842_s20  ;;  %s33_s29 = sadd.s32 1, %s1866_s26  ;;  %s1874_s28 = sphi %s1943_s28, %s24_s28   ;;  %s1870_s27 = sphi %s1941_s27, %s2427_s27   ;;  %s1866_s26 = sphi %s1939_s26, %s2433_s26   ;;  %s1862_s25 = sphi %s1937_s25, %s2425_s25   ;;  %s1858_s24 = sphi %s1935_s24, %s2424_s24   ;;  %s1854_s23 = sphi %s1933_s23, %s2432_s23   ;;  %s1850_s22 = sphi %s1931_s22, %s2431_s22   ;;  %s1846_s21 = sphi %s1929_s21, %s2430_s21   ;;  %s1842_s20 = sphi %s1927_s20, %s2423_s20   ;;  %s1838_s19 = sphi %s1925_s19, %s2429_s19   ;;  %s1834_s18 = sphi %s1923_s18, %s2428_s18  }
  0x10   : > { %2389 = sst [smem:[#allocation15_spill]] %s1862_s25  ;;  %p2373_p0 = scmp.eq.s32.totalorder %s1874_s28, 0 }
  0x11   : > { %2390 = sst [smem:[#allocation16_spill]] %s1866_s26  ;;  %p1980_p1 = scmp.ge.s32.totalorder %s33_s29, 2 }
  0x12   : > { %2391 = sst [smem:[#allocation17_spill]] %s1870_s27  ;;  %s69_s6 = sadd.s32 1, %s1842_s20 }
  0x13   : > { %p76_p2 = scmp.ne.s32.totalorder %s1842_s20, %s1838_s19  ;;  %s2435_s29 = smov (%p1980_p1, %s33_s29), 0 }
  0x14   : > { %2393 = sst [smem:[#allocation18_spill]] %s2435_s29  ;;  %s66_s7 = ssub.s32 %s1866_s26, %s2435_s29 }
  0x15   : > { %p78_p3 = por %p76_p2, %p2373_p0  ;;  %p2372_p4 = scmp.lt.s32.totalorder %s1874_s28, 4 }
  0x16   : > { %p67_p5 = scmp.eq.s32.totalorder %s66_s7, 0  ;;  %s228_s8 = sand.u32 1, %s1874_s28  }
  0x17   : > { %s230_s9 = sand.u32 1, %s1842_s20   ;;  %s2370_s12 = sshll.u32 %s1866_s26, 9 }
  0x18   : > { %s1999_s10 = scalar_select %p67_p5, %s1842_s20, %s69_s6  }
  0x19   : > { %s2001_s11 = sshll.u32 %s230_s9, 5  ;;  %s2395_s1 = sld [smem:[#allocation21_spill]] }
  0x1a   : > { %2394 = sst [smem:[#allocation19_spill]] %s1999_s10  ;;  %s232_s16 = scalar_lea.vmem [#allocation7], %s2001_s11 }
  0x1b   : > { %s239_s17 = sshll.u32 %s232_s16, 4  ;;  %p2014_p6 = pnand %p2372_p4, %p78_p3  ;;  %s2018_s17 = int_to_ptr.vmem [resolvable:$true] %s239_s17 }
  0x1c   : > { %s2020_s7 = scalar_lea.sflag [#allocation8], %s228_s8 }
  0x1d   : > { %p2374_p8 = pneg %p2014_p6 }
  0x1f   : > { %s2009_s15 = scalar_lea.hbm %s2395_s1, %s2370_s12  ;;  %s1663_s16 = scalar_lea.hbm %s2395_s1, 1024 }
  0x20   : > { %s1658_s9 = scalar_lea.hbm %s2009_s15, 512  ;;  %p1664_p11 = scmp.lt.u32.totalorder %s2009_s15, %s2395_s1 }
  0x21   : > { %p1659_p7 = scmp.ne.s32.totalorder %s2009_s15, %s1658_s9  ;;  %p1665_p12 = scmp.lt.u32.totalorder %s1663_s16, %s1658_s9 }
  0x22   : > { %p1667_p2 = scmp.lt.u32.totalorder %s1658_s9, %s2009_s15 }
  0x23   : > { %p1661_p9 = pnand %p2374_p8, %p1659_p7  ;;  %p1666_p13 = por %p1665_p12, %p1664_p11 }
  0x25   : > { %p1662_p10 = pneg %p1661_p9  ;;  %p1668_p3 = por %p1667_p2, %p1666_p13 }
  0x27   : > { %p1669_p5 = pnand %p1668_p3, %p1662_p10 }
  0x29   : > { %1672 = shalt.err (!%p1669_p5)
}
  0x2a   : > { %s1673_s8 = scalar_lea.vmem %s2018_s17, 512  ;;  %s1876_s13 = smov [#allocation7]  }
  0x2b   : > { %p1674_p7 = scmp.ne.s32.totalorder %s2018_s17, %s1673_s8  ;;  %s1678_s14 = sshll.u32 %s1876_s13, 4  ;;  %s1679_s14 = int_to_ptr.vmem [resolvable:$false] %s1678_s14 }
  0x2c   : > { %s1680_s29 = scalar_lea.vmem %s1679_s14, 1024  ;;  %p1681_p0 = scmp.lt.s32.totalorder %s2018_s17, %s1679_s14 }
  0x2d   : > { %p1676_p9 = pnand %p1674_p7, %p2374_p8  ;;  %p1682_p11 = scmp.lt.s32.totalorder %s1680_s29, %s1673_s8 }
  0x2f   : > { %p1677_p4 = pneg %p1676_p9  ;;  %p1683_p12 = por %p1682_p11, %p1681_p0 }
  0x31   : > { %p1684_p13 = pnand %p1683_p12, %p1677_p4 }
  0x33   : > { %1687 = shalt.err (!%p1684_p13)
}
  0x34   : > { %s2375_s12 = smov 128   ;;  %s2376_s9 = smov 8  }
  0x35   : > { %1531 = dma.hbm_to_vmem [thread:$0]  (!%p2014_p6), %s2009_s15, 512, %s2018_s17, %s2020_s7, %s2375_s12, %s2375_s12, %s2376_s9  }
  0x36   : > { %p82_p0 = scmp.ne.s32.totalorder %s1838_s19, %s1834_s18  ;;  %s2397_s16 = sshll.u32 %s1866_s26, 9 }
  0x37   : > { %s2058_s14 = scalar_lea.hbm %s2367_s3, %s2397_s16  ;;  %p1388_p4 = scmp.ge.s32.totalorder %s1874_s28, 1 }
  0x38   : > { %s259_s29 = scalar_lea.vmem [#allocation9], %s2001_s11  ;;  %p280_p10 = scmp.lt.s32.totalorder %s1874_s28, 5 }
  0x39   : > { %s266_s1 = sshll.u32 %s259_s29, 4  ;;  %s2068_s15 = sadd.s32 4294967295, %s1874_s28   ;;  %s2135_s1 = int_to_ptr.vmem [resolvable:$true] %s266_s1 }
  0x3a   : > { %p2063_p2 = pnand %p1388_p4, %p280_p10  ;;  %s1377_s17 = sadd.s32 4294967294, %s1874_s28  }
  0x3b   : > { %s36_s16 = sadd.s32 1, %s1870_s27  ;;  %s43_s11 = sadd.s32 1, %s1854_s23 }
  0x3c   : > { %s2398_s10 = scalar_select %p2063_p2, 1, 0 }
  0x3d   : > { %s2437_s16 = smov (!%p1980_p1, %s36_s16), %s1870_s27  ;;  %p50_p3 = scmp.ne.s32.totalorder %s1854_s23, %s1850_s22 }
  0x3e   : > { %p38_p5 = scmp.ge.s32.totalorder %s2437_s16, 2  ;;  %p56_p7 = scmp.ne.s32.totalorder %s1850_s22, %s1846_s21 }
  0x3f   : > { %p2399_p9 = scmp.eq.s32.totalorder %s1874_s28, 0  ;;  %p57_p12 = scmp.eq.s32.totalorder %s2068_s15, 0 }
  0x40   : > { %s2439_s16 = smov (%p38_p5, %s2437_s16), 0  ;;  %p184_p4 = scmp.eq.s32.totalorder %s2068_s15, 3 }
  0x41   : > { %p2082_p11 = por %p2399_p9, %p50_p3  ;;  %2401 = sst [smem:[#allocation20_spill]] %s2439_s16 }
  0x42   : > { %p2092_p1 = por %p57_p12, %p56_p7  ;;  %p2099_p13 = por %p82_p0, %p57_p12 }
  0x43   : > { %s40_s29 = ssub.s32 %s1870_s27, %s2439_s16  ;;  %p190_p9 = scmp.eq.s32.totalorder %s1377_s17, 3 }
  0x44   : > { %s2402_s30 = scalar_select %p2092_p1, 1, 0 }
  0x45   : > { %s2403_s13 = scalar_select %p2099_p13, 1, 0 }
  0x46   : > { %p41_p10 = scmp.eq.s32.totalorder %s40_s29, 0  ;;  %p2106_p8 = por %p184_p4, %p50_p3 }
  0x47   : > { %s210_s9 = sand.u32 1, %s1854_s23   ;;  %p2117_p5 = por %p190_p9, %p56_p7 }
  0x48   : > { %s2404_s12 = scalar_select %p2106_p8, 1, 0 }
  0x49   : > { %s2112_s26 = scalar_select %p41_p10, %s1854_s23, %s43_s11  }
  0x4a   : > { %s2405_s20 = scalar_select %p2117_p5, 1, 0 }
  0x4b   : > { %s1380_s18 = sshll.u32 %s210_s9, 3  ;;  %s1381_s5 = sshll.u32 %s1870_s27, 7 }
  0x4c   : > { %s2125_s16 = scalar_lea.hbm %s2364_s0, %s1381_s5  ;;  %s214_s17 = scalar_lea.vmem [#allocation4], %s1380_s18 }
  0x4d   : > { %s221_s29 = sshll.u32 %s214_s17, 4  ;;  %p2406_p0 = scmp.lt.s32.totalorder %s1874_s28, 4  ;;  %s2137_s29 = int_to_ptr.vmem [resolvable:$true] %s221_s29 }
  0x4e   : > { %s211_s4 = scalar_lea.sflag [#allocation5], %s210_s9  ;;  %s1688_s5 = scalar_lea.hbm %s2125_s16, 128 }
  0x4f   : > { %p2131_p3 = pnand %p2406_p0, %p2082_p11  ;;  %p1689_p7 = scmp.ne.s32.totalorder %s2125_s16, %s1688_s5 }
  0x50   : > { %s1693_s18 = scalar_lea.hbm %s2364_s0, 256  ;;  %p1694_p11 = scmp.lt.u32.totalorder %s2125_s16, %s2364_s0 }
  0x51   : > { %p1690_p12 = pneg %p2131_p3  ;;  %p1695_p9 = scmp.lt.u32.totalorder %s1693_s18, %s1688_s5 }
  0x52   : > { %p1697_p5 = scmp.lt.u32.totalorder %s1688_s5, %s2125_s16 }
  0x53   : > { %p1691_p4 = pnand %p1690_p12, %p1689_p7  ;;  %p1696_p0 = por %p1695_p9, %p1694_p11 }
  0x55   : > { %p1692_p10 = pneg %p1691_p4  ;;  %p1698_p8 = por %p1697_p5, %p1696_p0 }
  0x57   : > { %p1699_p13 = pnand %p1698_p8, %p1692_p10 }
  0x59   : > { %1702 = shalt.err (!%p1699_p13)
}
  0x5a   : > { %s1703_s9 = scalar_lea.vmem %s2137_s29, 128  ;;  %s1879_s25 = smov [#allocation4]  }
  0x5b   : > { %p1704_p7 = scmp.ne.s32.totalorder %s2137_s29, %s1703_s9  ;;  %s1708_s8 = sshll.u32 %s1879_s25, 4  ;;  %s1709_s8 = int_to_ptr.vmem [resolvable:$false] %s1708_s8 }
  0x5c   : > { %s1710_s27 = scalar_lea.vmem %s1709_s8, 256  ;;  %p1711_p2 = scmp.lt.s32.totalorder %s2137_s29, %s1709_s8 }
  0x5d   : > { %p1706_p4 = pnand %p1704_p7, %p1690_p12  ;;  %p1712_p11 = scmp.lt.s32.totalorder %s1710_s27, %s1703_s9 }
  0x5f   : > { %p1707_p1 = pneg %p1706_p4  ;;  %p1713_p9 = por %p1712_p11, %p1711_p2 }
  0x61   : > { %p1714_p5 = pnand %p1713_p9, %p1707_p1 }
  0x63   : > { %1717 = shalt.err (!%p1714_p5)
}
  0x64   : > { %1528 = dma.hbm_to_vmem [thread:$0]  (!%p2131_p3), %s2125_s16, 128, %s2137_s29, %s211_s4  }
  0x65   : > { %s1718_s5 = scalar_lea.hbm %s2058_s14, 512  ;;  %p2408_p13 = pneg %p2014_p6 }
  0x66   : > { %p1719_p8 = scmp.ne.s32.totalorder %s2058_s14, %s1718_s5  ;;  %s1723_s9 = scalar_lea.hbm %s2367_s3, 1024 }
  0x67   : > { %p1724_p2 = scmp.lt.u32.totalorder %s2058_s14, %s2367_s3  ;;  %p1725_p1 = scmp.lt.u32.totalorder %s1723_s9, %s1718_s5 }
  0x68   : > { %p1721_p12 = pnand %p1719_p8, %p2408_p13  ;;  %p1727_p7 = scmp.lt.u32.totalorder %s1718_s5, %s2058_s14 }
  0x69   : > { %p1726_p0 = por %p1725_p1, %p1724_p2 }
  0x6a   : > { %p1722_p10 = pneg %p1721_p12 }
  0x6b   : > { %p1728_p4 = por %p1727_p7, %p1726_p0 }
  0x6d   : > { %p1729_p11 = pnand %p1728_p4, %p1722_p10 }
  0x6f   : > { %1732 = shalt.err (!%p1729_p11)
}
  0x70   : > { %s1733_s16 = scalar_lea.vmem %s2135_s1, 512  ;;  %p2409_p9 = pmov %p2408_p13 }
  0x71   : > { %p1734_p3 = scmp.ne.s32.totalorder %s2135_s1, %s1733_s16  ;;  %s1880_s29 = smov [#allocation9]  }
  0x72   : > { %s1738_s4 = sshll.u32 %s1880_s29, 4  ;;  %s1739_s4 = int_to_ptr.vmem [resolvable:$false] %s1738_s4 }
  0x73   : > { %p1736_p5 = pnand %p1734_p3, %p2409_p9  ;;  %s1740_s8 = scalar_lea.vmem %s1739_s4, 1024 }
  0x74   : > { %p1741_p13 = scmp.lt.s32.totalorder %s2135_s1, %s1739_s4  ;;  %p1742_p12 = scmp.lt.s32.totalorder %s1740_s8, %s1733_s16 }
  0x75   : > { %p1737_p8 = pneg %p1736_p5 }
  0x76   : > { %p1743_p2 = por %p1742_p12, %p1741_p13 }
  0x78   : > { %p1744_p1 = pnand %p1743_p2, %p1737_p8 }
  0x7a   : > { %1747 = shalt.err (!%p1744_p1)
}
  0x7b   : > { %s2410_s27 = smov 8   ;;  %s2411_s5 = smov 128  }
  0x7c   : > { %1534 = dma.hbm_to_vmem [thread:$0]  (!%p2014_p6), %s2058_s14, 512, %s2135_s1, %s2020_s7, %s2411_s5, %s2411_s5, %s2410_s27  }
  0x7d   : > { %p2412_p10 = scmp.ne.s32.totalorder %s2398_s10, 0 }
  0x7e   : > { %s2194_s18 = sand.u32 (!%p2412_p10), 1, %s1850_s22   ;;  %p2413_p0 = scmp.ne.s32.totalorder (!%p2412_p10), %s2402_s30, 0 }
  0x7f   : > { %284 = sbr.rel (%p2412_p10) target bundleno = 1567 (0x61f), region = 40  ;;  %s1389_s17 = sshll.u32 (!%p2412_p10), %s2194_s18, 3 }
  0x80   : > { %s287_s9 = scalar_lea.sflag (!%p2412_p10), [#allocation5], %s2194_s18  ;;  %s290_s25 = scalar_lea.vmem (!%p2412_p10), [#allocation4], %s1389_s17 }
  0x86   : > { %1821 = dma.done.wait (%p2413_p0), %s287_s9, 128  }
  0x87   : > { %1823 = vsyncadd (%p2413_p0), %s287_s9, 4294967168  ;;  %s295_s1 = sand.u32 1, %s2068_s15   ;;  %s297_s10 = sand.u32 1, %s1838_s19  }
  0x88   : > { %s1390_s6 = sshll.u32 %s297_s10, 5  ;;  %s296_s7 = scalar_lea.sflag [#allocation8], %s295_s1 }
  0x89   : > { %s299_s14 = scalar_lea.vmem [#allocation7], %s1390_s6  ;;  %p2414_p6 = scmp.ne.s32.totalorder %s2403_s13, 0 }
  0x8b   : > { %1825 = dma.done.wait (%p2414_p6), %s296_s7, 1024  }
  0x8c   : > { %1827 = vsyncadd (%p2414_p6), %s296_s7, 4294966272  ;;  %p351_p7 = scmp.lt.s32.totalorder %s1858_s24, 1  ;;  %s2415_s8 = sld [smem:[#allocation22_spill]] }
  0x8d   : > { %s2220_s5 = scalar_lea.vmem [#allocation9], %s1390_s6  ;;  %s2222_s9 = scalar_lea.vmem [#allocation10], %s1389_s17 }
  0x8e   : > { %s2210_s11 = scalar_select %p351_p7, %s1858_s24, 1 }
  0x8f   : > { %p1393_p4 = scmp.ne.s32.totalorder %s1858_s24, 0 }
  0x90   : > { %s353_s15 = scalar_lea.vmem %s2366_s2, %s2210_s11  ;;  %v361_v0 = vld [vmem:[%s290_s25] sm:$0xff] (!%p1393_p4)  ;;  %vm362_vm0 = vcmask (!%p1393_p4), 261120  }
  0x91   : > { %360 = sbr.rel (%p1393_p4) target bundleno = 152 (0x98), region = 56  ;;  %363 = vst.msk [vmem:[#allocation2] sm:$0xff] (!%p1393_p4), %vm362_vm0, %v361_v0 }
  0x92   : > { %s356_s27 = scalar_lea.vmem %s2415_s8, %s2210_s11 }
  0x98 PF: > { %v365_v1 = vld [vmem:[%s299_s14] sm:$0xff]  ;;  %v366_v2 = vld [vmem:[%s299_s14 + $0x8] sm:$0xff]  ;;  %v367_v3 = vld [vmem:[%s299_s14 + $0x10] sm:$0xff]  ;;  %v1881_v4 = vmov 0.0|0.0   ;;  %vm1882_vm1 = vmmov 0   ;;  %v1883_v7 = vmov 0.0  }
  0x99   : > { %1505 = vmatprep.subr.bf16.mxu0 %v1881_v4  ;;  %v1506_v5 = vpack.c.bf16 %v366_v2, %v365_v1  ;;  %v368_v6 = vld [vmem:[%s299_s14 + $0x18] sm:$0xff]  ;;  %1451 = vmatprep.mubr.msk.f32.mxu0 %vm1882_vm1, %v1883_v7  ;;  %v364_v9 = vld [vmem:[#allocation2] sm:$0xff]  ;;  %vm376_vm2 = vcmask 261120   ;;  %s1884_s25 = smov 104   ;;  %s1885_s1 = smov 120   ;;  %vm459_vm3 = vcmask 64512  }
  0x9a   : > { %1454 = vmatprep.subr.mxu1 %v1883_v7  ;;  %1456 = vmatprep.mubr.msk.f32.mxu1 %vm1882_vm1, %v1883_v7  ;;  %v1509_v8 = vpack.c.bf16 %v368_v6, %v367_v3  ;;  %v1394_v10 = vld [vmem:[%s353_s15] ss:$0 sm:$0xff]  ;;  %s1886_s10 = smov 96   ;;  %s1887_s6 = smov 112   ;;  %v1131_v2 = vld [vmem:[%s2220_s5 + $0x8] sm:$0xff]  ;;  %v1133_v6 = vld [vmem:[%s2220_s5 + $0x18] sm:$0xff] }
  0x9b   : > { %1507 = vmatpush3.bf16.msra.mxu0 %v1506_v5  ;;  %s1888_s7 = smov 64   ;;  %v1130_v1 = vld [vmem:[%s2220_s5] sm:$0xff]  ;;  %v1132_v5 = vld [vmem:[%s2220_s5 + $0x10] sm:$0xff]  ;;  %s1889_s14 = smov 8   ;;  %vm1115_vm4 = vcmask 130112   ;;  %vm1121_vm5 = vcmask 195712  }
  0x9c   : > { %1508 = vmatprep.subr.bf16.mxu0 %v1881_v4  ;;  %v1512_v3 = vpack.c.bf16 %v1131_v2, %v1130_v1  ;;  %s1890_s30 = smov 16   ;;  %s1891_s16 = smov 24   ;;  %vm1127_vm6 = vcmask 261312  }
  0x9d   : > { %p1410_p11 = scmp.ne.s32.totalorder %s1858_s24, 1 }
  0x9f   : > { %1510 = vmatpush3.bf16.msra.mxu0 %v1509_v8 }
  0xa0   : > { %1474 = vmatprep.subr.mxu0 %v1883_v7 }
  0xa2   : > { %1452 = vmatmul.mubr.msk.f32.vlgmr.msra.gmra.mrb[0].mxu0 %vm376_vm2, %v364_v9  ;;  %v1515_v9 = vpack.c.bf16 %v1133_v6, %v1132_v5 }
  0xa3   : > { %1476 = vmatprep.mubr.msk.f32.mxu0 %vm1882_vm1, %v1883_v7 }
 0x175   : > { %v446_v11 = vpop.f32.mrb[0].mxu0 }
 0x176   : > { %v447_v12 = vadd.f32 %v1394_v10, %v446_v11  ;;  %v1453_v13 = vpop.f32.mrb[1].mxu0 }
 0x178   : > { %455 = vrot.lane.b32.xlu1 %v447_v12, %s1884_s25  ;;  %451 = vrot.lane.b32.xlu0 %v447_v12, %s1885_s1 }
 0x17c   : > { %457 = vrot.lane.b32.xlu1 %v447_v12, %s1886_s10  ;;  %453 = vrot.lane.b32.xlu0 %v447_v12, %s1887_s6 }
 0x1ea   : > { %v456_v14 = vpop.permute.xlu1 %455  ;;  %v452_v15 = vpop.permute.xlu0 %451 }
 0x1eb   : > { %534 = vrot.lane.b32.xlu0 %v452_v15, %s1886_s10 }
 0x1ee   : > { %v458_v16 = vpop.permute.xlu1 %457  ;;  %v454_v17 = vpop.permute.xlu0 %453 }
 0x1ef   : > { %1455 = vmatpush3.xpose.msk.msra.mxu1 %vm459_vm3, %v458_v16  ;;  %686 = vrot.lane.b32.xlu0 %v456_v14, %s1886_s10 }
 0x1f0   : > { %610 = vrot.lane.b32.xlu1 %v454_v17, %s1886_s10  ;;  %1459 = vmatprep.subr.mxu1 %v1883_v7 }
 0x1f2   : > { %1457 = vmatmul.mubr.msk.f32.vlgmr.msra.gmra.mrb[0].mxu1 %vm459_vm3, %v447_v12 }
 0x1f3   : > { %798 = vrot.lane.b32.xlu0 %v447_v12, %s1888_s7  ;;  %1461 = vmatprep.mubr.msk.f32.mxu1 %vm1882_vm1, %v1883_v7 }
 0x1f4   : > { %874 = vrot.lane.b32.xlu1 %v452_v15, %s1888_s7 }
 0x25d   : > { %v535_v18 = vpop.permute.xlu0 %534 }
 0x25e   : > { %1460 = vmatpush3.xpose.msk.msra.mxu1 %vm459_vm3, %v535_v18 }
 0x25f   : > { %1464 = vmatprep.subr.mxu1 %v1883_v7 }
 0x261   : > { %1462 = vmatmul.mubr.msk.f32.vlgmr.msra.gmra.mrb[2].mxu1 %vm459_vm3, %v452_v15  ;;  %v687_v19 = vpop.permute.xlu0 %686 }
 0x262   : > { %v611_v20 = vpop.permute.xlu1 %610  ;;  %1466 = vmatprep.mubr.msk.f32.mxu1 %vm1882_vm1, %v1883_v7 }
 0x263   : > { %1465 = vmatpush3.xpose.msk.msra.mxu1 %vm459_vm3, %v611_v20 }
 0x264   : > { %1469 = vmatprep.subr.mxu1 %v1883_v7 }
 0x265   : > { %v799_v21 = vpop.permute.xlu0 %798 }
 0x266   : > { %1467 = vmatmul.mubr.msk.f32.vlgmr.msra.gmra.mrb[4].mxu1 %vm459_vm3, %v454_v17  ;;  %1475 = vmatpush3.msra.mxu0 %v799_v21  ;;  %v875_v22 = vpop.permute.xlu1 %874 }
 0x267   : > { %1470 = vmatpush3.xpose.msk.msra.mxu1 %vm459_vm3, %v687_v19  ;;  %1471 = vmatprep.mubr.msk.f32.mxu1 %vm1882_vm1, %v1883_v7 }
 0x268   : > { %1479 = vmatprep.subr.mxu1 %v1883_v7  ;;  %1484 = vmatprep.subr.mxu0 %v1883_v7 }
 0x26a   : > { %1472 = vmatmul.mubr.msk.f32.vlgmr.msra.gmra.mrb[6].mxu1 %vm459_vm3, %v456_v14 }
 0x26b   : > { %1480 = vmatpush3.msra.mxu1 %v875_v22  ;;  %1481 = vmatprep.mubr.msk.f32.mxu1 %vm1882_vm1, %v1883_v7 }
 0x26c   : > { %1489 = vmatprep.subr.mxu1 %v1883_v7 }
 0x2c5   : > { %v530_v23 = vpop.f32.mrb[0].mxu1 }
 0x2c6   : > { %v1458_v24 = vpop.f32.mrb[1].mxu1  ;;  %v762_v25 = vsel %vm459_vm3, %v530_v23, -inf }
 0x2c7   : > { %763 = vmax.xlane.f32.xlu1 %v762_v25 }
 0x334   : > { %v606_v26 = vpop.f32.mrb[2].mxu1 }
 0x335   : > { %v1463_v27 = vpop.f32.mrb[3].mxu1  ;;  %v765_v28 = vsel %vm459_vm3, %v606_v26, -inf }
 0x336   : > { %766 = vmax.xlane.f32.xlu0 %v765_v28 }
 0x339   : > { %v682_v29 = vpop.f32.mrb[4].mxu1 }
 0x33a   : > { %v1468_v30 = vpop.f32.mrb[5].mxu1  ;;  %v768_v31 = vsel %vm459_vm3, %v682_v29, -inf }
 0x33b   : > { %769 = vmax.xlane.f32.xlu0 %v768_v31 }
 0x33d   : > { %v758_v32 = vpop.f32.mrb[6].mxu1 }
 0x33e   : > { %v1473_v33 = vpop.f32.mrb[7].mxu1  ;;  %v771_v34 = vsel %vm459_vm3, %v758_v32, -inf }
 0x33f   : > { %772 = vmax.xlane.f32.xlu1 %v771_v34 }
 0x350   : > { %950 = vrot.lane.b32.xlu1 %v454_v17, %s1888_s7 }
 0x351   : > { %1026 = vrot.lane.b32.xlu0 %v456_v14, %s1888_s7 }
 0x354   : > { %v764_v35 = vpop.xlane.xlu1 %763 }
 0x355   : > { %v774_v36 = vsub.f32 %v530_v23, %v764_v35  ;;  %v1408_v23 = vld [vmem:[%s356_s27] ss:$0 sm:$0xff] }
 0x357   : > { %v778_v37 = vmul.f32 1.442695, %v774_v36 }
 0x359   : > { %1642 = vpow2.f32 %v778_v37 }
 0x363   : > { %v1643_v38 = vpop.eup %1642 }
 0x364   : > { %1477 = vmatmul.mubr.msk.f32.vlgmr.msra.gmra.mrb[2].mxu0 %vm459_vm3, %v1643_v38  ;;  %v786_v53 = vsel %vm459_vm3, %v1643_v38, 0.0 }
 0x365   : > { %1486 = vmatprep.mubr.msk.f32.mxu0 %vm1882_vm1, %v1883_v7 }
 0x3c3   : > { %v767_v39 = vpop.xlane.xlu0 %766 }
 0x3c4   : > { %v775_v40 = vsub.f32 %v606_v26, %v767_v39 }
 0x3c6   : > { %v780_v41 = vmul.f32 1.442695, %v775_v40 }
 0x3c8   : > { %1644 = vpow2.f32 %v780_v41  ;;  %v770_v42 = vpop.xlane.xlu0 %769 }
 0x3c9   : > { %v776_v43 = vsub.f32 %v682_v29, %v770_v42 }
 0x3cb   : > { %v782_v44 = vmul.f32 1.442695, %v776_v43 }
 0x3cc   : > { %v773_v45 = vpop.xlane.xlu1 %772  ;;  %v1027_v50 = vpop.permute.xlu0 %1026 }
 0x3cd   : > { %1646 = vpow2.f32 %v782_v44  ;;  %v777_v46 = vsub.f32 %v758_v32, %v773_v45 }
 0x3cf   : > { %v784_v47 = vmul.f32 1.442695, %v777_v46 }
 0x3d0   : > { %v951_v48 = vpop.permute.xlu1 %950 }
 0x3d1   : > { %1648 = vpow2.f32 %v784_v47  ;;  %1485 = vmatpush3.msra.mxu0 %v951_v48 }
 0x3d2   : > { %v1645_v49 = vpop.eup %1644  ;;  %1511 = vmatprep.subr.bf16.mxu0 %v1881_v4 }
 0x3d3   : > { %1482 = vmatmul.mubr.msk.f32.vlgmr.msra.gmra.mrb[8].mxu1 %vm459_vm3, %v1645_v49  ;;  %v789_v51 = vsel %vm459_vm3, %v1645_v49, 0.0 }
 0x3d4   : > { %1490 = vmatpush3.msra.mxu1 %v1027_v50  ;;  %790 = vadd.xlane.f32.xlu1 %v789_v51 }
 0x3d5   : > { %1491 = vmatprep.mubr.msk.f32.mxu1 %vm1882_vm1, %v1883_v7 }
 0x3d7   : > { %v1647_v52 = vpop.eup %1646 }
 0x3d8   : > { %1487 = vmatmul.mubr.msk.f32.vlgmr.msra.gmra.mrb[4].mxu0 %vm459_vm3, %v1647_v52  ;;  %787 = vadd.xlane.f32.xlu1 %v786_v53  ;;  %v792_v54 = vsel %vm459_vm3, %v1647_v52, 0.0 }
 0x3d9   : > { %793 = vadd.xlane.f32.xlu0 %v792_v54  ;;  %1502 = vmatprep.mubr.msk.f32.mxu0 %vm1882_vm1, %v1883_v7 }
 0x3da   : > { %1513 = vmatpush3.bf16.msra.mxu0 %v1512_v3 }
 0x3db   : > { %v1649_v55 = vpop.eup %1648  ;;  %1514 = vmatprep.subr.bf16.mxu0 %v1881_v4 }
 0x3dc   : > { %1492 = vmatmul.mubr.msk.f32.vlgmr.msra.gmra.mrb[10].mxu1 %vm459_vm3, %v1649_v55  ;;  %v795_v56 = vsel %vm459_vm3, %v1649_v55, 0.0 }
 0x3dd   : > { %796 = vadd.xlane.f32.xlu0 %v795_v56 }
 0x3de   : > { %1516 = vmatpush3.bf16.msra.mxu0 %v1515_v9 }
 0x437   : > { %v870_v57 = vpop.f32.mrb[2].mxu0 }
 0x438   : > { %v1478_v58 = vpop.f32.mrb[3].mxu0 }
 0x461   : > { %v791_v59 = vpop.xlane.xlu1 %790 }
 0x465   : > { %v788_v60 = vpop.xlane.xlu1 %787 }
 0x466   : > { %1650 = vrcp.f32 %v788_v60  ;;  %v794_v63 = vpop.xlane.xlu0 %793 }
 0x467   : > { %1652 = vrcp.f32 %v791_v59 }
 0x468   : > { %1654 = vrcp.f32 %v794_v63 }
 0x46a   : > { %v797_v0 = vpop.xlane.xlu0 %796 }
 0x46b   : > { %1656 = vrcp.f32 %v797_v0 }
 0x470   : > { %v1651_v61 = vpop.eup %1650 }
 0x471   : > { %v1106_v62 = vmul.f32 %v1651_v61, %v870_v57  ;;  %v1653_v7 = vpop.eup %1652 }
 0x472   : > { %v1655_v12 = vpop.eup %1654 }
 0x473   : > { %1110 = vst.msk [vmem:[#allocation3] sm:$0xff] %vm459_vm3, %v1106_v62 }
 0x475   : > { %v1657_v16 = vpop.eup %1656 }
 0x4a6   : > { %v946_v8 = vpop.f32.mrb[8].mxu1 }
 0x4a7   : > { %v1107_v10 = vmul.f32 %v1653_v7, %v946_v8  ;;  %v1483_v11 = vpop.f32.mrb[9].mxu1 }
 0x4a9   : > { %1112 = vrot.lane.b32.xlu0 %v1107_v10, %s1889_s14 }
 0x4ab   : > { %v1022_v13 = vpop.f32.mrb[4].mxu0 }
 0x4ac   : > { %v1108_v14 = vmul.f32 %v1655_v12, %v1022_v13  ;;  %v1488_v15 = vpop.f32.mrb[5].mxu0 }
 0x4ae   : > { %1118 = vrot.lane.b32.xlu1 %v1108_v14, %s1890_s30 }
 0x4af   : > { %v1098_v17 = vpop.f32.mrb[10].mxu1 }
 0x4b0   : > { %v1109_v18 = vmul.f32 %v1657_v16, %v1098_v17  ;;  %v1493_v19 = vpop.f32.mrb[11].mxu1 }
 0x4b2   : > { %1124 = vrot.lane.b32.xlu1 %v1109_v18, %s1891_s16 }
 0x51b   : > { %v1113_v20 = vpop.permute.xlu0 %1112 }
 0x51c   : > { %1116 = vst.msk [vmem:[#allocation3] sm:$0xff] %vm1115_vm4, %v1113_v20 }
 0x520   : > { %v1119_v4 = vpop.permute.xlu1 %1118 }
 0x521   : > { %1122 = vst.msk [vmem:[#allocation3] sm:$0xff] %vm1121_vm5, %v1119_v4 }
 0x524   : > { %v1125_v21 = vpop.permute.xlu1 %1124 }
 0x525   : > { %1128 = vst.msk [vmem:[#allocation3] sm:$0xff] %vm1127_vm6, %v1125_v21 }
 0x52c   : > { %v1129_v22 = vld [vmem:[#allocation3] sm:$0xff] }
 0x52d   : > { %1503 = vmatmul.mubr.msk.f32.vlgmr.msra.gmra.mrb[6].mxu0 %vm376_vm2, %v1129_v22 }
 0x5fd   : > { %1218 = sbr.rel (%p1410_p11) target bundleno = 1540 (0x604), region = 60 }
 0x600   : > { %v1210_v24 = vpop.f32.mrb[6].mxu0 }
 0x601   : > { %v1211_v25 = vadd.f32 %v1408_v23, %v1210_v24  ;;  %v1504_v26 = vpop.f32.mrb[7].mxu0 }
 0x603   : > { %1214 = vst.msk [vmem:[#allocation2] sm:$0xff] %vm376_vm2, %v1211_v25  ;;  %1219 = vst.msk [vmem:[%s2222_s9] sm:$0xff] (!%p1410_p11), %vm376_vm2, %v1211_v25 }
 0x604 PF: > { %s2417_s8 = sld [smem:[#allocation15_spill]]  ;;  %s2418_s27 = sld [smem:[#allocation23_spill]] }
 0x605   : > { %s1234_s1 = sshll.u32 %s2222_s9, 4  ;;  %s1221_s10 = scalar_lea.sflag [#allocation6], %s2194_s18  ;;  %s1235_s1 = int_to_ptr.vmem [resolvable:$true] %s1234_s1 }
 0x606   : > { %s1748_s6 = scalar_lea.vmem %s1235_s1, 128  ;;  %p2420_p9 = scmp.ne.s32.totalorder %s2404_s12, 0 }
 0x607   : > { %p1749_p3 = scmp.ne.s32.totalorder %s1235_s1, %s1748_s6  ;;  %s1892_s24 = smov [#allocation10]  }
 0x608   : > { %s1752_s7 = sshll.u32 %s1892_s24, 4  ;;  %s1753_s7 = int_to_ptr.vmem [resolvable:$false] %s1752_s7 }
 0x609   : > { %p1750_p5 = pnand %p1749_p3, %p2420_p9  ;;  %s1754_s14 = scalar_lea.vmem %s1753_s7, 256 }
 0x60a   : > { %s1412_s5 = sshll.u32 %s2417_s8, 7  ;;  %s2419_s17 = smov %s2418_s27 }
 0x60b   : > { %s2306_s25 = scalar_lea.hbm %s2418_s27, %s1412_s5  ;;  %p1751_p8 = pneg %p1750_p5 }
 0x60c   : > { %p1755_p13 = scmp.lt.s32.totalorder %s1235_s1, %s1753_s7  ;;  %p1756_p12 = scmp.lt.s32.totalorder %s1754_s14, %s1748_s6 }
 0x60e   : > { %p1757_p2 = por %p1756_p12, %p1755_p13 }
 0x610   : > { %p1758_p1 = pnand %p1757_p2, %p1751_p8 }
 0x612   : > { %1761 = shalt.err (!%p1758_p1)
}
 0x613   : > { %s1762_s18 = scalar_lea.hbm %s2306_s25, 128  ;;  %s1766_s16 = scalar_lea.hbm %s2419_s17, 256 }
 0x614   : > { %p1763_p10 = scmp.ne.s32.totalorder %s2306_s25, %s1762_s18  ;;  %p1767_p7 = scmp.lt.u32.totalorder %s2306_s25, %s2419_s17 }
 0x615   : > { %p1768_p4 = scmp.lt.u32.totalorder %s1766_s16, %s1762_s18  ;;  %p1770_p3 = scmp.lt.u32.totalorder %s1762_s18, %s2306_s25 }
 0x616   : > { %p1764_p0 = pnand %p1763_p10, %p2420_p9 }
 0x617   : > { %p1769_p11 = por %p1768_p4, %p1767_p7 }
 0x618   : > { %p1765_p6 = pneg %p1764_p0 }
 0x619   : > { %p1771_p5 = por %p1770_p3, %p1769_p11 }
 0x61b   : > { %p1772_p8 = pnand %p1771_p5, %p1765_p6 }
 0x61d   : > { %1775 = shalt.err (!%p1772_p8)
}
 0x61e   : > { %1523 = dma.vmem_to_hbm [thread:$0]  (%p2420_p9), %s1235_s1, 128, %s2306_s25, %s1221_s10  }
 0x61f PF: > { %p1540_p13 = scmp.ge.s32.totalorder %s1874_s28, 2  ;;  %s1246_s4 = sand.u32 1, %s1846_s21  }
 0x620   : > { %p2421_p12 = scmp.ne.s32.totalorder %s2405_s20, 0  ;;  %s1247_s8 = scalar_lea.sflag [#allocation6], %s1246_s4 }
 0x622   : > { %p1536_p2 = pnand %p1540_p13, %p2421_p12 }
 0x624   : > { %1829 = dma.done.wait (!%p1536_p2), %s1247_s8, 128  }
 0x625   : > { %1831 = vsyncadd (!%p1536_p2), %s1247_s8, 4294967168  ;;  %s24_s28 = sadd.s32 1, %s1874_s28   ;;  %s2422_s5 = sld [smem:[#allocation14_spill]] }
 0x626   : > { %p21_p1 = scmp.ge.s32.totalorder %s24_s28, 6   ;;  %s2423_s20 = sld [smem:[#allocation19_spill]] }
 0x627   : > { %s2424_s24 = sld [smem:[#allocation16_spill]]  ;;  %s2425_s25 = sld [smem:[#allocation17_spill]] }
 0x628   : > { %s2426_s12 = sld [smem:[#allocation18_spill]]  ;;  %s2427_s27 = sld [smem:[#allocation20_spill]] }
 0x629   : > { %s2428_s18 = smov %s1838_s19  ;;  %s2430_s21 = smov %s1850_s22 }
 0x62a   : > { %s2431_s22 = smov %s1854_s23  ;;  %s2432_s23 = smov %s2112_s26 }
 0x62b   : > { %s2429_s19 = smov %s2422_s5  ;;  %23 = sbr.rel (!%p21_p1) target bundleno = 15 (0xf), region = 123 }
 0x62e   : > { %s2433_s26 = smov %s2426_s12 }
 0x632   :  { %1252 = vsyncpa [#allocation5], 1 }
 0x633   :  { %1254 = vsyncpa [#allocation5 + $0x1], 1 }
 0x634   :  { %1255 = vsyncpa [#allocation8], 1 }
 0x635   :  { %1257 = vsyncpa [#allocation8 + $0x1], 1 }
 0x636   :  { %1258 = vsyncpa [#allocation6], 1 }
 0x637   :  { %1260 = vsyncpa [#allocation6 + $0x1], 1 }

</bundles_post_ra>
